<compile_context>
chip_gen: v7x
topology: tpu7x:2x2x1
jax: 0.10.0
libtpu: 0.0.40
codegen_flags: <defaults>
</compile_context>

<pallas_src>
import jax
import jax.numpy as jnp
from jax.experimental import pallas as pl
from jax.experimental.pallas import tpu as pltpu

_IN = 514
_H1, _H2, _H3 = 256, 128, 64


def _mlp_kernel(x_ref,
                w1_ref, b1_ref,
                w2_ref, b2_ref,
                w3_ref, b3_ref,
                w4_ref, b4_ref,
                o_ref):
    # x tile: (TM, 514) bf16 streamed from HBM (no in-kernel cast needed).
    x = x_ref[...]

    h = jnp.dot(x, w1_ref[...], preferred_element_type=jnp.float32) + b1_ref[...]
    h = jnp.maximum(h, 0.0)

    h = jnp.dot(h.astype(jnp.bfloat16), w2_ref[...],
                preferred_element_type=jnp.float32) + b2_ref[...]
    h = jnp.maximum(h, 0.0)

    h = jnp.dot(h.astype(jnp.bfloat16), w3_ref[...],
                preferred_element_type=jnp.float32) + b3_ref[...]
    h = jnp.maximum(h, 0.0)

    # Final layer has N=1: do it on the VPU/XLU instead of an underfilled MXU
    # pass.  w4_ref is the (1, 64) weight row, b4_ref is (1, 1).
    logit = jnp.sum(h * w4_ref[...], axis=-1, keepdims=True) + b4_ref[...]
    o_ref[...] = jax.nn.sigmoid(logit)


def _round_up(x, m):
    return ((x + m - 1) // m) * m


def discriminator_forward(rg, params, *, tm_max=2048):
    """rg: (B, 514) array.  params: dict of fp32 weights/biases.  Returns (B, 1) fp32.

    tm_max: max batch rows per grid step.  2048 keeps the double-buffered bf16
    input tile (~2 x 2.6 MB) plus fp32 activations well inside the raised
    48 MiB scoped-VMEM limit on every generation (v5e 128 MiB / v6e 128 MiB /
    v7x 64 MiB physical) while amortizing the ~0.35 us per-step overhead.
    """
    B = rg.shape[0]
    assert rg.shape[1] == _IN

    # Stream the input as bf16: the MXU already discards fp32 precision, so
    # numerics are unchanged, but the dominant HBM traffic is halved.
    rg = rg.astype(jnp.bfloat16)

    # --- batch-tile selection: balanced tiles, even grid for v7x megacore ---
    b_pad8 = _round_up(B, 8)
    num_tiles = max(pl.cdiv(b_pad8, tm_max), 1)
    if b_pad8 >= 16:                 # enough rows for >=2 tiles of >=8 rows
        if num_tiles < 2:
            num_tiles = 2            # give both v7x TensorCores work
        elif num_tiles % 2:
            num_tiles += 1           # even grid -> perfect 2-way core sharding
    tm = _round_up(pl.cdiv(b_pad8, num_tiles), 8)   # balanced: <8 pad rows/tile
    b_pad = num_tiles * tm
    if b_pad != B:
        rg = jnp.pad(rg, ((0, b_pad - B), (0, 0)))

    # Weights: bf16 for the MXU (fp32 accumulation in-kernel). Biases stay fp32.
    w1 = params["w1"].astype(jnp.bfloat16)                    # (514, 256)
    w2 = params["w2"].astype(jnp.bfloat16)                    # (256, 128)
    w3 = params["w3"].astype(jnp.bfloat16)                    # (128, 64)
    w4 = params["w4"].reshape(1, _H3).astype(jnp.float32)     # (1, 64) row for VPU
    b1, b2, b3 = params["b1"], params["b2"], params["b3"]     # (1, 256/128/64)
    b4 = params["b4"].reshape(1, 1)                           # (1, 1)

    const = lambda i: (0, 0)     # weights/biases: resident in VMEM across the grid
    resident = dict(pipeline_mode=pl.Buffered(1))   # single buffer (never re-DMA'd)
    in_specs = [
        pl.BlockSpec((tm, _IN), lambda i: (i, 0)),            # x tile (double-buffered)
        pl.BlockSpec((_IN, _H1), const, **resident),
        pl.BlockSpec((1, _H1), const, **resident),
        pl.BlockSpec((_H1, _H2), const, **resident),
        pl.BlockSpec((1, _H2), const, **resident),
        pl.BlockSpec((_H2, _H3), const, **resident),
        pl.BlockSpec((1, _H3), const, **resident),
        pl.BlockSpec((1, _H3), const, **resident),
        pl.BlockSpec((1, 1), const, **resident),
    ]

    flops_per_row = 2 * (_IN * _H1 + _H1 * _H2 + _H2 * _H3 + _H3)
    weight_bytes = (2 * (_IN * _H1 + _H1 * _H2 + _H2 * _H3)   # bf16 weights
                    + 4 * (_H1 + _H2 + _H3 + _H3 + 1))        # fp32 biases + w4 row
    cost = pl.CostEstimate(
        flops=b_pad * flops_per_row,
        transcendentals=b_pad,                                 # sigmoid -> exp
        bytes_accessed=b_pad * (_IN * 2 + 4) + weight_bytes,   # bf16 in, fp32 out
    )

    out = pl.pallas_call(
        _mlp_kernel,
        out_shape=jax.ShapeDtypeStruct((b_pad, 1), jnp.float32),
        grid=(num_tiles,),
        in_specs=in_specs,
        out_specs=pl.BlockSpec((tm, 1), lambda i: (i, 0)),
        compiler_params=pltpu.CompilerParams(
            dimension_semantics=("parallel",),
            vmem_limit_bytes=48 * 1024 * 1024),
        cost_estimate=cost,
    )(rg, w1, b1, w2, b2, w3, b3, w4, b4)

    return out[:B]


def init_params(key):
    """Deterministic init mimicking PyTorch's default Linear init:
    U(-1/sqrt(fan_in), 1/sqrt(fan_in)) for both weight and bias.
    Weights stored as (in_features, out_features), biases as (1, out)."""
    sizes = [(_IN, _H1), (_H1, _H2), (_H2, _H3), (_H3, 1)]
    params = {}
    keys = jax.random.split(key, 2 * len(sizes))
    for i, (fan_in, fan_out) in enumerate(sizes):
        bound = 1.0 / jnp.sqrt(jnp.float32(fan_in))
        params[f"w{i + 1}"] = jax.random.uniform(
            keys[2 * i], (fan_in, fan_out), minval=-bound, maxval=bound,
            dtype=jnp.float32)
        params[f"b{i + 1}"] = jax.random.uniform(
            keys[2 * i + 1], (1, fan_out), minval=-bound, maxval=bound,
            dtype=jnp.float32)
    return params


def _reference_forward(rg, p):
    h = jnp.maximum(rg @ p["w1"] + p["b1"], 0.0)
    h = jnp.maximum(h @ p["w2"] + p["b2"], 0.0)
    h = jnp.maximum(h @ p["w3"] + p["b3"], 0.0)
    return jax.nn.sigmoid(h @ p["w4"] + p["b4"])


if __name__ == "__main__":
    key = jax.random.PRNGKey(0)
    k_params, k_x1, k_x2, k_x3 = jax.random.split(key, 4)

    params = init_params(k_params)

    # Case 1: tiny batch -> single-tile grid.
    B1 = 8
    rg1 = jax.random.normal(k_x1, (B1, _IN), dtype=jnp.float32)
    out1 = jax.block_until_ready(discriminator_forward(rg1, params))
    ref1 = _reference_forward(rg1, params)
    assert out1.shape == (B1, 1)
    # bf16 input + bf16 matmuls (fp32 accumulate) -> loosened tolerance.
    assert jnp.allclose(out1, ref1, atol=2.5e-2, rtol=2.5e-2)

    # Case 2: batch not divisible by 8 -> padding + even 2-tile grid.
    B2 = 13
    rg2 = jax.random.normal(k_x2, (B2, _IN), dtype=jnp.float32)
    out2 = jax.block_until_ready(discriminator_forward(rg2, params))
    ref2 = _reference_forward(rg2, params)
    assert out2.shape == (B2, 1)
    assert jnp.allclose(out2, ref2, atol=2.5e-2, rtol=2.5e-2)

    # Case 3: small tm_max -> exercises balanced-tile selection (4 tiles of 16).
    B3 = 50
    rg3 = jax.random.normal(k_x3, (B3, _IN), dtype=jnp.float32)
    out3 = jax.block_until_ready(discriminator_forward(rg3, params, tm_max=16))
    ref3 = _reference_forward(rg3, params)
    assert out3.shape == (B3, 1)
    assert jnp.allclose(out3, ref3, atol=2.5e-2, rtol=2.5e-2)

    print("KERNEL_OK")
</pallas_src>

<mosaic_0001>
module attributes {stable_mosaic.version = 11 : i64} {
  func.func @_mlp_kernel(%arg0: i32, %arg1: memref<8x514xbf16, #tpu.memory_space<vmem>>, %arg2: memref<514x256xbf16, #tpu.memory_space<vmem>>, %arg3: memref<1x256xf32, #tpu.memory_space<vmem>>, %arg4: memref<256x128xbf16, #tpu.memory_space<vmem>>, %arg5: memref<1x128xf32, #tpu.memory_space<vmem>>, %arg6: memref<128x64xbf16, #tpu.memory_space<vmem>>, %arg7: memref<1x64xf32, #tpu.memory_space<vmem>>, %arg8: memref<1x64xf32, #tpu.memory_space<vmem>>, %arg9: memref<1x1xf32, #tpu.memory_space<vmem>>, %arg10: memref<8x1xf32, #tpu.memory_space<vmem>>) attributes {dimension_semantics = [#tpu.dimension_semantics<parallel>], iteration_bounds = array<i64: 1>, scalar_prefetch = 0 : i64, scratch_operands = 0 : i64, tpu.core_type = #tpu.core_type<tc>, window_params = [{transform_indices = @transform_0, window_bounds = array<i64: 8, 514>}, {pipeline_mode = #tpu.pipeline_mode<synchronous>, transform_indices = @transform_1, window_bounds = array<i64: 514, 256>}, {pipeline_mode = #tpu.pipeline_mode<synchronous>, transform_indices = @transform_2, window_bounds = array<i64: 1, 256>}, {pipeline_mode = #tpu.pipeline_mode<synchronous>, transform_indices = @transform_3, window_bounds = array<i64: 256, 128>}, {pipeline_mode = #tpu.pipeline_mode<synchronous>, transform_indices = @transform_4, window_bounds = array<i64: 1, 128>}, {pipeline_mode = #tpu.pipeline_mode<synchronous>, transform_indices = @transform_5, window_bounds = array<i64: 128, 64>}, {pipeline_mode = #tpu.pipeline_mode<synchronous>, transform_indices = @transform_6, window_bounds = array<i64: 1, 64>}, {pipeline_mode = #tpu.pipeline_mode<synchronous>, transform_indices = @transform_7, window_bounds = array<i64: 1, 64>}, {pipeline_mode = #tpu.pipeline_mode<synchronous>, transform_indices = @transform_8, window_bounds = array<i64: 1, 1>}, {transform_indices = @transform_9, window_bounds = array<i64: 8, 1>}]} {
    %c0 = arith.constant 0 : index
    %c0_0 = arith.constant 0 : index
    %0 = vector.load %arg1[%c0, %c0_0] : memref<8x514xbf16, #tpu.memory_space<vmem>>, vector<8x514xbf16>
    %c0_1 = arith.constant 0 : index
    %c0_2 = arith.constant 0 : index
    %1 = vector.load %arg2[%c0_1, %c0_2] : memref<514x256xbf16, #tpu.memory_space<vmem>>, vector<514x256xbf16>
    %cst = arith.constant dense<0.000000e+00> : vector<8x256xf32>
    %2 = tpu.matmul %0, %1, %cst {dimension_numbers = #tpu.dot_dimension_numbers<[1], [0], [0], [1], [0, 0, 1, 1], [], []>} : vector<8x514xbf16>, vector<514x256xbf16>, vector<8x256xf32> -> vector<8x256xf32>
    %c0_3 = arith.constant 0 : index
    %c0_4 = arith.constant 0 : index
    %3 = vector.load %arg3[%c0_3, %c0_4] : memref<1x256xf32, #tpu.memory_space<vmem>>, vector<1x256xf32>
    %4 = vector.broadcast %3 : vector<1x256xf32> to vector<8x256xf32>
    %5 = arith.addf %2, %4 : vector<8x256xf32>
    %cst_5 = arith.constant 0.000000e+00 : f32
    %6 = vector.broadcast %cst_5 : f32 to vector<8x256xf32>
    %7 = arith.maximumf %5, %6 : vector<8x256xf32>
    %8 = arith.truncf %7 : vector<8x256xf32> to vector<8x256xbf16>
    %c0_6 = arith.constant 0 : index
    %c0_7 = arith.constant 0 : index
    %9 = vector.load %arg4[%c0_6, %c0_7] : memref<256x128xbf16, #tpu.memory_space<vmem>>, vector<256x128xbf16>
    %cst_8 = arith.constant dense<0.000000e+00> : vector<8x128xf32>
    %10 = tpu.matmul %8, %9, %cst_8 {dimension_numbers = #tpu.dot_dimension_numbers<[1], [0], [0], [1], [0, 0, 1, 1], [], []>} : vector<8x256xbf16>, vector<256x128xbf16>, vector<8x128xf32> -> vector<8x128xf32>
    %c0_9 = arith.constant 0 : index
    %c0_10 = arith.constant 0 : index
    %11 = vector.load %arg5[%c0_9, %c0_10] : memref<1x128xf32, #tpu.memory_space<vmem>>, vector<1x128xf32>
    %12 = vector.broadcast %11 : vector<1x128xf32> to vector<8x128xf32>
    %13 = arith.addf %10, %12 : vector<8x128xf32>
    %cst_11 = arith.constant 0.000000e+00 : f32
    %14 = vector.broadcast %cst_11 : f32 to vector<8x128xf32>
    %15 = arith.maximumf %13, %14 : vector<8x128xf32>
    %16 = arith.truncf %15 : vector<8x128xf32> to vector<8x128xbf16>
    %c0_12 = arith.constant 0 : index
    %c0_13 = arith.constant 0 : index
    %17 = vector.load %arg6[%c0_12, %c0_13] : memref<128x64xbf16, #tpu.memory_space<vmem>>, vector<128x64xbf16>
    %cst_14 = arith.constant dense<0.000000e+00> : vector<8x64xf32>
    %18 = tpu.matmul %16, %17, %cst_14 {dimension_numbers = #tpu.dot_dimension_numbers<[1], [0], [0], [1], [0, 0, 1, 1], [], []>} : vector<8x128xbf16>, vector<128x64xbf16>, vector<8x64xf32> -> vector<8x64xf32>
    %c0_15 = arith.constant 0 : index
    %c0_16 = arith.constant 0 : index
    %19 = vector.load %arg7[%c0_15, %c0_16] : memref<1x64xf32, #tpu.memory_space<vmem>>, vector<1x64xf32>
    %20 = vector.broadcast %19 : vector<1x64xf32> to vector<8x64xf32>
    %21 = arith.addf %18, %20 : vector<8x64xf32>
    %cst_17 = arith.constant 0.000000e+00 : f32
    %22 = vector.broadcast %cst_17 : f32 to vector<8x64xf32>
    %23 = arith.maximumf %21, %22 : vector<8x64xf32>
    %c0_18 = arith.constant 0 : index
    %c0_19 = arith.constant 0 : index
    %24 = vector.load %arg8[%c0_18, %c0_19] : memref<1x64xf32, #tpu.memory_space<vmem>>, vector<1x64xf32>
    %25 = vector.broadcast %24 : vector<1x64xf32> to vector<8x64xf32>
    %26 = arith.mulf %23, %25 : vector<8x64xf32>
    %cst_20 = arith.constant dense<0.000000e+00> : vector<8xf32>
    %27 = vector.multi_reduction <add>, %26, %cst_20 [1] : vector<8x64xf32> to vector<8xf32>
    %28 = vector.shape_cast %27 : vector<8xf32> to vector<8x1xf32>
    %c0_21 = arith.constant 0 : index
    %c0_22 = arith.constant 0 : index
    %29 = vector.load %arg9[%c0_21, %c0_22] : memref<1x1xf32, #tpu.memory_space<vmem>>, vector<1x1xf32>
    %30 = vector.broadcast %29 : vector<1x1xf32> to vector<8x1xf32>
    %31 = arith.addf %28, %30 : vector<8x1xf32>
    %32 = arith.negf %31 : vector<8x1xf32>
    %33 = math.exp %32 : vector<8x1xf32>
    %cst_23 = arith.constant 1.000000e+00 : f32
    %34 = vector.broadcast %cst_23 : f32 to vector<8x1xf32>
    %35 = arith.addf %34, %33 : vector<8x1xf32>
    %36 = arith.divf %34, %35 : vector<8x1xf32>
    %c0_24 = arith.constant 0 : index
    %c0_25 = arith.constant 0 : index
    %37 = vector.load %arg10[%c0_24, %c0_25] : memref<8x1xf32, #tpu.memory_space<vmem>>, vector<8x1xf32>
    tpu.vector_store %arg10[%c0_24, %c0_25], %36 {strides = array<i32>} : memref<8x1xf32, #tpu.memory_space<vmem>>, vector<8x1xf32>,
    return
  }
  func.func @transform_0(%arg0: i32) -> (i32, i32) {
    %c0_i32 = arith.constant 0 : i32
    %c0_i32_0 = arith.constant 0 : i32
    return %arg0, %c0_i32 : i32, i32
  }
  func.func @transform_1(%arg0: i32) -> (i32, i32) {
    %c0_i32 = arith.constant 0 : i32
    %c0_i32_0 = arith.constant 0 : i32
    %c0_i32_1 = arith.constant 0 : i32
    return %c0_i32, %c0_i32_0 : i32, i32
  }
  func.func @transform_2(%arg0: i32) -> (i32, i32) {
    %c0_i32 = arith.constant 0 : i32
    %c0_i32_0 = arith.constant 0 : i32
    %c0_i32_1 = arith.constant 0 : i32
    return %c0_i32, %c0_i32_0 : i32, i32
  }
  func.func @transform_3(%arg0: i32) -> (i32, i32) {
    %c0_i32 = arith.constant 0 : i32
    %c0_i32_0 = arith.constant 0 : i32
    %c0_i32_1 = arith.constant 0 : i32
    return %c0_i32, %c0_i32_0 : i32, i32
  }
  func.func @transform_4(%arg0: i32) -> (i32, i32) {
    %c0_i32 = arith.constant 0 : i32
    %c0_i32_0 = arith.constant 0 : i32
    %c0_i32_1 = arith.constant 0 : i32
    return %c0_i32, %c0_i32_0 : i32, i32
  }
  func.func @transform_5(%arg0: i32) -> (i32, i32) {
    %c0_i32 = arith.constant 0 : i32
    %c0_i32_0 = arith.constant 0 : i32
    %c0_i32_1 = arith.constant 0 : i32
    return %c0_i32, %c0_i32_0 : i32, i32
  }
  func.func @transform_6(%arg0: i32) -> (i32, i32) {
    %c0_i32 = arith.constant 0 : i32
    %c0_i32_0 = arith.constant 0 : i32
    %c0_i32_1 = arith.constant 0 : i32
    return %c0_i32, %c0_i32_0 : i32, i32
  }
  func.func @transform_7(%arg0: i32) -> (i32, i32) {
    %c0_i32 = arith.constant 0 : i32
    %c0_i32_0 = arith.constant 0 : i32
    %c0_i32_1 = arith.constant 0 : i32
    return %c0_i32, %c0_i32_0 : i32, i32
  }
  func.func @transform_8(%arg0: i32) -> (i32, i32) {
    %c0_i32 = arith.constant 0 : i32
    %c0_i32_0 = arith.constant 0 : i32
    %c0_i32_1 = arith.constant 0 : i32
    return %c0_i32, %c0_i32_0 : i32, i32
  }
  func.func @transform_9(%arg0: i32) -> (i32, i32) {
    %c0_i32 = arith.constant 0 : i32
    %c0_i32_0 = arith.constant 0 : i32
    return %arg0, %c0_i32 : i32, i32
  }
}

</mosaic_0001>

<bundles_post_ra>
// kernel: tpu_custom_call.1
= control target key start
LH: loop header
LB: loop body
LE: loop exit
PB: predicated region body
PF: predicated region fallthrough
CT: control target
= control target key end

     0   :  { %s1431_s0 = inlined_call_operand.vmem [shape: bf16[8,514], index: 0, kind: input, shape index: {}]   ;;  %s1432_s1 = inlined_call_operand.hbm [shape: bf16[514,256], index: 1, kind: input, shape index: {}]   ;;  %s1433_s2 = inlined_call_operand.vmem [shape: f32[1,256], index: 2, kind: input, shape index: {}]   ;;  %s1434_s3 = inlined_call_operand.hbm [shape: bf16[256,128], index: 3, kind: input, shape index: {}]   ;;  %s1435_s4 = inlined_call_operand.vmem [shape: f32[1,128], index: 4, kind: input, shape index: {}]   ;;  %s1436_s5 = inlined_call_operand.vmem [shape: bf16[128,64], index: 5, kind: input, shape index: {}]   ;;  %s1437_s6 = inlined_call_operand.vmem [shape: f32[1,64], index: 6, kind: input, shape index: {}]   ;;  %s1438_s7 = inlined_call_operand.vmem [shape: f32[1,64], index: 7, kind: input, shape index: {}]   ;;  %s1439_s8 = inlined_call_operand.<no memory space> [shape: f32[1,1], index: 8, kind: input, shape index: {}]   ;;  %s1440_s9 = inlined_call_operand.vmem [shape: f32[8,1], index: 9, kind: output, shape index: {}]  }
   0x1   :  { %v14_v0 = vstv %s1439_s8 }
   0x2   :  { %15 = vst [vmem:[#allocation2] sm:$0x1] %v14_v0 }
   0x3   :  { %16 = vsyncpa [#allocation4], 0 }
   0x4   :  { %17 = vsyncpa [#allocation6], 0  ;;  %s1295_s11 = smov [#allocation3]   ;;  %s1247_s15 = scalar_lea.hbm %s1432_s1, 8320 }
   0x5   :  { %s25_s12 = sshll.u32 %s1295_s11, 4  ;;  %p1248_p0 = scmp.ne.s32.totalorder %s1432_s1, %s1247_s15  ;;  %s26_s12 = int_to_ptr.vmem [resolvable:$true] %s25_s12 }
   0x6   :  { %p1251_p1 = scmp.lt.u32.totalorder %s1247_s15, %s1432_s1 }
   0x8   :  { %p1253_p2 = pnand %p1251_p1, %p1248_p0 }
   0xa   :  { %1256 = shalt.err (!%p1253_p2)
}
   0xb   :  { %s1257_s8 = scalar_lea.vmem %s26_s12, 8320  ;;  %p1262_p4 = scmp.lt.s32.totalorder %s26_s12, %s26_s12 }
   0xc   :  { %p1258_p3 = scmp.ne.s32.totalorder %s26_s12, %s1257_s8  ;;  %p1263_p5 = scmp.lt.s32.totalorder %s1257_s8, %s1257_s8 }
   0xe   :  { %p1264_p6 = por %p1263_p5, %p1262_p4 }
  0x10   :  { %p1265_p7 = pnand %p1264_p6, %p1258_p3 }
  0x12   :  { %1268 = shalt.err (!%p1265_p7)
}
  0x13   :  { %s1296_s20 = smov 128   ;;  %s1297_s21 = smov 8  }
  0x14   :  { %31 = dma.hbm_to_vmem [thread:$0]  %s1432_s1, 8320, %s26_s12, [#allocation4], %s1296_s20, %s1296_s20, %s1297_s21  }
  0x15   :  { %s1298_s24 = smov [#allocation5]   ;;  %s1269_s28 = scalar_lea.hbm %s1434_s3, 2048 }
  0x16   :  { %s39_s25 = sshll.u32 %s1298_s24, 4  ;;  %p1270_p8 = scmp.ne.s32.totalorder %s1434_s3, %s1269_s28  ;;  %s40_s25 = int_to_ptr.vmem [resolvable:$true] %s39_s25 }
  0x17   :  { %p1273_p9 = scmp.lt.u32.totalorder %s1269_s28, %s1434_s3 }
  0x19   :  { %p1275_p10 = pnand %p1273_p9, %p1270_p8 }
  0x1b   :  { %1278 = shalt.err (!%p1275_p10)
}
  0x1c   :  { %s1279_s13 = scalar_lea.vmem %s40_s25, 2048  ;;  %p1284_p12 = scmp.lt.s32.totalorder %s40_s25, %s40_s25 }
  0x1d   :  { %p1280_p11 = scmp.ne.s32.totalorder %s40_s25, %s1279_s13  ;;  %p1285_p13 = scmp.lt.s32.totalorder %s1279_s13, %s1279_s13 }
  0x1f   :  { %p1286_p0 = por %p1285_p13, %p1284_p12 }
  0x21   :  { %p1287_p1 = pnand %p1286_p0, %p1280_p11 }
  0x23   :  { %1290 = shalt.err (!%p1287_p1)
}
  0x24   :  { %s1299_s1 = smov 64   ;;  %s1300_s12 = smov 4  }
  0x25   :  { %45 = dma.hbm_to_vmem [thread:$0]  %s1434_s3, 2048, %s40_s25, [#allocation6], %s1299_s1, %s1299_s1, %s1300_s12  }
  0x26   :  { %1291 = dma.done.wait [#allocation4], 8320  }
  0x27   :  { %1292 = vsyncadd [#allocation4], 4294958976 }
  0x28   :  { %1293 = dma.done.wait [#allocation6], 2048  }
  0x29   :  { %1294 = vsyncadd [#allocation6], 4294965248  ;;  %v1116_v1 = vld [vmem:[#allocation3 + $0x104] ss:$8 sps:$4 sm:$0xff]   ;;  %v1118_v2 = vld [vmem:[#allocation3 + $0x100] ss:$8 sps:$4 sm:$0xff]  }
  0x2a   :  { %537 = vmatprep.subr.bf16.mxu0 %v1116_v1  ;;  %v1119_v3 = vld [vmem:[#allocation3 + $0x114] ss:$8 sps:$4 sm:$0xff]   ;;  %v1121_v4 = vld [vmem:[#allocation3 + $0x110] ss:$8 sps:$4 sm:$0xff]   ;;  %v1122_v5 = vld [vmem:[#allocation3 + $0x4] ss:$8 sps:$4 sm:$0xff]  }
  0x2b   :  { %538 = vmatpush1.bf16.msra.mxu0 %v1118_v2  ;;  %v1124_v6 = vld [vmem:[#allocation3 + $0x124] ss:$8 sps:$4 sm:$0xff]   ;;  %v1126_v7 = vld [vmem:[#allocation3] ss:$8 sps:$4 sm:$0xff]   ;;  %496 = vmatprep.subr.bf16.mxu1 %v1122_v5  ;;  %v1128_v8 = vld [vmem:[#allocation3 + $0x14] ss:$8 sps:$4 sm:$0xff]  }
  0x2c   :  { %539 = vmatprep.subr.bf16.mxu0 %v1119_v3  ;;  %497 = vmatpush1.bf16.msra.mxu1 %v1126_v7  ;;  %v1127_v9 = vld [vmem:[#allocation3 + $0x120] ss:$8 sps:$4 sm:$0xff]   ;;  %v1130_v10 = vld [vmem:[#allocation3 + $0x134] ss:$8 sps:$4 sm:$0xff]   ;;  %v1132_v11 = vld [vmem:[#allocation3 + $0x10] ss:$8 sps:$4 sm:$0xff]  }
  0x2d   :  { %498 = vmatprep.subr.bf16.mxu1 %v1128_v8  ;;  %v1134_v12 = vld [vmem:[#allocation3 + $0x24] ss:$8 sps:$4 sm:$0xff]   ;;  %v1133_v13 = vld [vmem:[#allocation3 + $0x130] ss:$8 sps:$4 sm:$0xff]   ;;  %v1138_v14 = vld [vmem:[#allocation3 + $0x20] ss:$8 sps:$4 sm:$0xff]  }
  0x2e   :  { %v1140_v15 = vld [vmem:[#allocation3 + $0x34] ss:$8 sps:$4 sm:$0xff]   ;;  %v1136_v16 = vld [vmem:[#allocation3 + $0x144] ss:$8 sps:$4 sm:$0xff]   ;;  %v1144_v17 = vld [vmem:[#allocation3 + $0x30] ss:$8 sps:$4 sm:$0xff]  }
  0x2f   :  { %540 = vmatpush1.bf16.msra.mxu0 %v1121_v4  ;;  %v1139_v18 = vld [vmem:[#allocation3 + $0x140] ss:$8 sps:$4 sm:$0xff]   ;;  %v1146_v19 = vld [vmem:[#allocation3 + $0x44] ss:$8 sps:$4 sm:$0xff]   ;;  %v1142_v20 = vld [vmem:[#allocation3 + $0x154] ss:$8 sps:$4 sm:$0xff]  }
  0x30   :  { %541 = vmatprep.subr.bf16.mxu0 %v1124_v6  ;;  %499 = vmatpush1.bf16.msra.mxu1 %v1132_v11  ;;  %v1145_v21 = vld [vmem:[#allocation3 + $0x150] ss:$8 sps:$4 sm:$0xff]   ;;  %v1150_v22 = vld [vmem:[#allocation3 + $0x40] ss:$8 sps:$4 sm:$0xff]   ;;  %v1152_v23 = vld [vmem:[#allocation3 + $0x54] ss:$8 sps:$4 sm:$0xff]  }
  0x31   :  { %500 = vmatprep.subr.bf16.mxu1 %v1134_v12  ;;  %v1148_v24 = vld [vmem:[#allocation3 + $0x164] ss:$8 sps:$4 sm:$0xff]   ;;  %v1156_v25 = vld [vmem:[#allocation3 + $0x50] ss:$8 sps:$4 sm:$0xff]   ;;  %v1151_v26 = vld [vmem:[#allocation3 + $0x160] ss:$8 sps:$4 sm:$0xff]  }
  0x32   :  { %v1158_v27 = vld [vmem:[#allocation3 + $0x64] ss:$8 sps:$4 sm:$0xff]   ;;  %v1154_v28 = vld [vmem:[#allocation3 + $0x174] ss:$8 sps:$4 sm:$0xff]   ;;  %v1157_v29 = vld [vmem:[#allocation3 + $0x170] ss:$8 sps:$4 sm:$0xff]  }
  0x33   :  { %542 = vmatpush1.bf16.msra.mxu0 %v1127_v9  ;;  %v1162_v30 = vld [vmem:[#allocation3 + $0x60] ss:$8 sps:$4 sm:$0xff]   ;;  %v1164_v31 = vld [vmem:[#allocation3 + $0x74] ss:$8 sps:$4 sm:$0xff]   ;;  %v1160_v32 = vld [vmem:[#allocation3 + $0x184] ss:$8 sps:$4 sm:$0xff]  }
  0x34   :  { %543 = vmatprep.subr.bf16.mxu0 %v1130_v10  ;;  %501 = vmatpush1.bf16.msra.mxu1 %v1138_v14  ;;  %v1168_v33 = vld [vmem:[#allocation3 + $0x70] ss:$8 sps:$4 sm:$0xff]   ;;  %v1163_v34 = vld [vmem:[#allocation3 + $0x180] ss:$8 sps:$4 sm:$0xff]   ;;  %v1170_v35 = vld [vmem:[#allocation3 + $0x84] ss:$8 sps:$4 sm:$0xff]  }
  0x35   :  { %502 = vmatprep.subr.bf16.mxu1 %v1140_v15  ;;  %v1166_v36 = vld [vmem:[#allocation3 + $0x194] ss:$8 sps:$4 sm:$0xff]   ;;  %v1169_v37 = vld [vmem:[#allocation3 + $0x190] ss:$8 sps:$4 sm:$0xff]   ;;  %v1174_v38 = vld [vmem:[#allocation3 + $0x80] ss:$8 sps:$4 sm:$0xff]  }
  0x36   :  { %v1176_v39 = vld [vmem:[#allocation3 + $0x94] ss:$8 sps:$4 sm:$0xff]   ;;  %v1172_v40 = vld [vmem:[#allocation3 + $0x1a4] ss:$8 sps:$4 sm:$0xff]   ;;  %v1180_v41 = vld [vmem:[#allocation3 + $0x90] ss:$8 sps:$4 sm:$0xff]  }
  0x37   :  { %544 = vmatpush1.bf16.msra.mxu0 %v1133_v13  ;;  %v1175_v42 = vld [vmem:[#allocation3 + $0x1a0] ss:$8 sps:$4 sm:$0xff]   ;;  %v1178_v43 = vld [vmem:[#allocation3 + $0x1b4] ss:$8 sps:$4 sm:$0xff]   ;;  %v1182_v44 = vld [vmem:[#allocation3 + $0xa4] ss:$8 sps:$4 sm:$0xff]  }
  0x38   :  { %545 = vmatprep.subr.bf16.mxu0 %v1136_v16  ;;  %503 = vmatpush1.bf16.msra.mxu1 %v1144_v17  ;;  %v64_v45 = vld [vmem:[%s1431_s0 + $0x8] sm:$0xff]  ;;  %v1181_v46 = vld [vmem:[#allocation3 + $0x1b0] ss:$8 sps:$4 sm:$0xff]   ;;  %v1188_v49 = vld [vmem:[#allocation3 + $0xb4] ss:$8 sps:$4 sm:$0xff]   ;;  %vm489_vm0 = vcmask 1040384  }
  0x39   :  { %504 = vmatprep.subr.bf16.mxu1 %v1146_v19  ;;  %v949_v47 = vcombine.high %v64_v45, %v64_v45  ;;  %v1186_v48 = vld [vmem:[#allocation3 + $0xa0] ss:$8 sps:$4 sm:$0xff]   ;;  %v1184_v51 = vld [vmem:[#allocation3 + $0x1c4] ss:$8 sps:$4 sm:$0xff]   ;;  %v1192_v54 = vld [vmem:[#allocation3 + $0xb0] ss:$8 sps:$4 sm:$0xff]   ;;  %v948_v8 = vcombine.low %v64_v45, %v64_v45 }
  0x3a   :  { %v63_v50 = vld [vmem:[%s1431_s0] sm:$0xff]  ;;  %v1193_v57 = vld [vmem:[#allocation3 + $0x1d0] ss:$8 sps:$4 sm:$0xff]   ;;  %v1219_v10 = vld [vmem:[#allocation5 + $0x40] sm:$0xff]   ;;  %v1301_v12 = vmov 0   ;;  %vm485_vm1 = vcmask 15360  }
  0x3b   :  { %546 = vmatpush1.bf16.msra.mxu0 %v1139_v18  ;;  %569 = vmatprep.mubr.bf16.mxu0 %v949_v47  ;;  %v947_v52 = vcombine.high %v63_v50, %v63_v50  ;;  %v1187_v53 = vld [vmem:[#allocation3 + $0x1c0] ss:$8 sps:$4 sm:$0xff]   ;;  %v1194_v55 = vld [vmem:[#allocation3 + $0xc4] ss:$8 sps:$4 sm:$0xff]   ;;  %v1190_v56 = vld [vmem:[#allocation3 + $0x1d4] ss:$8 sps:$4 sm:$0xff]   ;;  %v946_v11 = vcombine.low %v63_v50, %v63_v50 }
  0x3c   :  { %547 = vmatprep.subr.bf16.mxu0 %v1142_v20  ;;  %505 = vmatpush1.bf16.msra.mxu1 %v1150_v22  ;;  %v1198_v58 = vld [vmem:[#allocation3 + $0xc0] ss:$8 sps:$4 sm:$0xff]   ;;  %v1200_v59 = vld [vmem:[#allocation3 + $0xd4] ss:$8 sps:$4 sm:$0xff]   ;;  %v1196_v60 = vld [vmem:[#allocation3 + $0x1e4] ss:$8 sps:$4 sm:$0xff]  }
  0x3d   :  { %506 = vmatprep.subr.bf16.mxu1 %v1152_v23  ;;  %528 = vmatprep.mubr.bf16.mxu1 %v947_v52  ;;  %v1199_v61 = vld [vmem:[#allocation3 + $0x1e0] ss:$8 sps:$4 sm:$0xff]   ;;  %v1202_v62 = vld [vmem:[#allocation3 + $0x1f4] ss:$8 sps:$4 sm:$0xff]   ;;  %v1204_v63 = vld [vmem:[#allocation3 + $0xd0] ss:$8 sps:$4 sm:$0xff]  }
  0x3e   :  { %v1208_v0 = vld [vmem:[#allocation3 + $0xe4] ss:$8 sps:$4 sm:$0xff]   ;;  %v1211_v2 = vld [vmem:[#allocation3 + $0xe0] ss:$8 sps:$4 sm:$0xff]   ;;  %v1205_v3 = vld [vmem:[#allocation3 + $0x1f0] ss:$8 sps:$4 sm:$0xff]  }
  0x3f   :  { %548 = vmatpush1.bf16.msra.mxu0 %v1145_v21  ;;  %v130_v1 = vld [vmem:[#allocation3 + $0x200] sm:$0x11]  ;;  %v1213_v4 = vld [vmem:[#allocation3 + $0xf4] ss:$8 sps:$4 sm:$0xff]   ;;  %v1215_v7 = vld [vmem:[#allocation3 + $0xf0] ss:$8 sps:$4 sm:$0xff]  }
  0x40   :  { %549 = vmatprep.subr.bf16.mxu0 %v1148_v24  ;;  %507 = vmatpush1.bf16.msra.mxu1 %v1156_v25  ;;  %v1016_v5 = vcombine.high %v130_v1, %v130_v1  ;;  %v1015_v6 = vcombine.low %v130_v1, %v130_v1  ;;  %v1218_v13 = vld [vmem:[%s1431_s0 + $0x10] ss:$0 sps:$4 sm:$0xff]   ;;  %v1221_v15 = vld [vmem:[#allocation5 + $0x48] sm:$0xff]   ;;  %v1223_v17 = vld [vmem:[#allocation5 + $0x50] sm:$0xff]   ;;  %vm1303_vm2 = vmmov 0   ;;  %vm920_vm3 = vcmask 523264  }
  0x41   :  { %508 = vmatprep.subr.bf16.mxu1 %v1158_v27  ;;  %v1220_v14 = vld [vmem:[#allocation5] sm:$0xff]   ;;  %v1222_v16 = vld [vmem:[#allocation5 + $0x8] sm:$0xff]   ;;  %v1224_v18 = vld [vmem:[#allocation5 + $0x10] sm:$0xff]   ;;  %vm938_vm4 = vcmask 7168  }
  0x42   :  { %v491_v9 = vsel %vm489_vm0, %v1015_v6, 0  ;;  %v1225_v19 = vld [vmem:[#allocation5 + $0x58] sm:$0xff]   ;;  %v1227_v21 = vld [vmem:[#allocation5 + $0x60] sm:$0xff]   ;;  %v1229_v23 = vld [vmem:[#allocation5 + $0x68] sm:$0xff]  }
  0x43   :  { %550 = vmatpush1.bf16.msra.mxu0 %v1151_v26  ;;  %v1226_v20 = vld [vmem:[#allocation5 + $0x18] sm:$0xff]   ;;  %v1228_v22 = vld [vmem:[#allocation5 + $0x20] sm:$0xff]   ;;  %v1230_v24 = vld [vmem:[#allocation5 + $0x28] sm:$0xff]  }
  0x44   :  { %551 = vmatprep.subr.bf16.mxu0 %v1154_v28  ;;  %509 = vmatpush1.bf16.msra.mxu1 %v1162_v30  ;;  %v1231_v25 = vld [vmem:[#allocation5 + $0x70] sm:$0xff]   ;;  %v1233_v27 = vld [vmem:[#allocation5 + $0x78] sm:$0xff]   ;;  %v1302_v30 = vmov 0.0  }
  0x45   :  { %510 = vmatprep.subr.bf16.mxu1 %v1164_v31  ;;  %v1232_v26 = vld [vmem:[#allocation5 + $0x30] sm:$0xff]   ;;  %v1234_v28 = vld [vmem:[#allocation5 + $0x38] sm:$0xff]  }
  0x46   :  { %v1236_v31 = vld [vmem:[%s1436_s5 + $0x8] sm:$0xff]   ;;  %v1036_v6 = vld [vmem:[%s1437_s6] ss:$0 sm:$0xff] }
  0x47   :  { %552 = vmatpush1.bf16.msra.mxu0 %v1157_v29  ;;  %v1235_v29 = vld [vmem:[%s1436_s5] sm:$0xff]  }
  0x48   :  { %553 = vmatprep.subr.bf16.mxu0 %v1160_v32  ;;  %511 = vmatpush1.bf16.msra.mxu1 %v1168_v33  ;;  %v1237_v32 = vld [vmem:[%s1436_s5 + $0x10] sm:$0xff]   ;;  %v1238_v33 = vld [vmem:[%s1436_s5 + $0x18] sm:$0xff]  }
  0x49   :  { %512 = vmatprep.subr.bf16.mxu1 %v1170_v35  ;;  %v1240_v35 = vld [vmem:[%s1436_s5 + $0x28] sm:$0xff]  }
  0x4b   :  { %554 = vmatpush1.bf16.msra.mxu0 %v1163_v34  ;;  %v1239_v34 = vld [vmem:[%s1436_s5 + $0x20] sm:$0xff]  }
  0x4c   :  { %555 = vmatprep.subr.bf16.mxu0 %v1166_v36  ;;  %513 = vmatpush1.bf16.msra.mxu1 %v1174_v38  ;;  %v133_v36 = vlaneseq }
  0x4d   :  { %514 = vmatprep.subr.bf16.mxu1 %v1176_v39  ;;  %v131_v39 = vld [vmem:[%s1433_s2] sm:$0x3] }
  0x4f   :  { %556 = vmatpush1.bf16.msra.mxu0 %v1169_v37  ;;  %v134_v37 = vshrl.u32 %v133_v36, 7 }
  0x50   :  { %557 = vmatprep.subr.bf16.mxu0 %v1172_v40  ;;  %515 = vmatpush1.bf16.msra.mxu1 %v1180_v41 }
  0x51   :  { %516 = vmatprep.subr.bf16.mxu1 %v1182_v44  ;;  %v135_v38 = vsub.s32 0, %v134_v37  ;;  %v139_v40 = vsub.s32 1, %v134_v37 }
  0x53   :  { %558 = vmatpush1.bf16.msra.mxu0 %v1175_v42  ;;  %v140_v45 = vrot.slane %v131_v39, %v139_v40 }
  0x54   :  { %559 = vmatprep.subr.bf16.mxu0 %v1178_v43  ;;  %517 = vmatpush1.bf16.msra.mxu1 %v1186_v48  ;;  %v136_v43 = vrot.slane %v131_v39, %v135_v38 }
  0x55   :  { %518 = vmatprep.subr.bf16.mxu1 %v1188_v49 }
  0x57   :  { %560 = vmatpush1.bf16.msra.mxu0 %v1181_v46 }
  0x58   :  { %561 = vmatprep.subr.bf16.mxu0 %v1184_v51  ;;  %519 = vmatpush1.bf16.msra.mxu1 %v1192_v54 }
  0x59   :  { %520 = vmatprep.subr.bf16.mxu1 %v1194_v55 }
  0x5b   :  { %562 = vmatpush1.bf16.msra.mxu0 %v1187_v53 }
  0x5c   :  { %563 = vmatprep.subr.bf16.mxu0 %v1190_v56  ;;  %521 = vmatpush1.bf16.msra.mxu1 %v1198_v58 }
  0x5d   :  { %522 = vmatprep.subr.bf16.mxu1 %v1200_v59  ;;  %v1241_v59 = vld [vmem:[%s1436_s5 + $0x30] sm:$0xff]  }
  0x5f   :  { %564 = vmatpush1.bf16.msra.mxu0 %v1193_v57 }
  0x60   :  { %565 = vmatprep.subr.bf16.mxu0 %v1196_v60  ;;  %523 = vmatpush1.bf16.msra.mxu1 %v1204_v63  ;;  %v1242_v60 = vld [vmem:[%s1436_s5 + $0x38] sm:$0xff]  }
  0x61   :  { %524 = vmatprep.subr.bf16.mxu1 %v1208_v0 }
  0x63   :  { %566 = vmatpush1.bf16.msra.mxu0 %v1199_v61 }
  0x64   :  { %567 = vmatprep.subr.bf16.mxu0 %v1202_v62  ;;  %525 = vmatpush1.bf16.msra.mxu1 %v1211_v2  ;;  %v1019_v62 = vld [vmem:[%s1435_s4] ss:$0 sm:$0xff] }
  0x65   :  { %526 = vmatprep.subr.bf16.mxu1 %v1213_v4 }
  0x67   :  { %568 = vmatpush1.bf16.msra.mxu0 %v1205_v3 }
  0x68   :  { %1017 = vmatprep.subr.msk.bf16.mxu0 %vm489_vm0, %v1016_v5  ;;  %527 = vmatpush1.bf16.msra.mxu1 %v1215_v7 }
  0x69   :  { %1079 = vmatprep.subr.bf16.mxu1 %v1302_v30 }
  0x6a   :  { %570 = vmatmul.mubr.bf16.vlgmr.msra.gmra.mrb[0].mxu0 %v948_v8 }
  0x6b   :  { %579 = vmatpush1.bf16.msra.mxu0 %v491_v9  ;;  %610 = vmatprep.mubr.bf16.mxu0 %v1301_v12 }
  0x6c   :  { %1048 = vmatprep.subr.bf16.mxu0 %v1219_v10  ;;  %529 = vmatmul.mubr.bf16.vlgmr.msra.gmra.mrb[0].mxu1 %v946_v11  ;;  %v1045_v11 = vld [vmem:[%s1438_s7] ss:$0 sm:$0xff] }
  0x6d   :  { %1080 = vmatpush3.bf16.msra.mxu1 %v1235_v29  ;;  %1095 = vmatprep.mubr.msk.bf16.mxu1 %vm1303_vm2, %v1302_v30 }
  0x6e   :  { %1081 = vmatprep.subr.bf16.mxu1 %v1302_v30 }
  0x71   :  { %1082 = vmatpush3.bf16.msra.mxu1 %v1236_v31 }
  0x72   :  { %1083 = vmatprep.subr.bf16.mxu1 %v1302_v30 }
  0x75   :  { %1084 = vmatpush3.bf16.msra.mxu1 %v1237_v32 }
  0x76   :  { %1018 = vmatmul.mubr.msk.bf16.vlgmr.msra.gmra.mrb[0].mxu0 %vm485_vm1, %v1218_v13  ;;  %1085 = vmatprep.subr.bf16.mxu1 %v1302_v30 }
  0x77   :  { %1049 = vmatpush3.bf16.msra.mxu0 %v1220_v14 }
  0x78   :  { %1050 = vmatprep.subr.bf16.mxu0 %v1221_v15 }
  0x79   :  { %1086 = vmatpush3.bf16.msra.mxu1 %v1238_v33 }
  0x7a   :  { %1087 = vmatprep.subr.bf16.mxu1 %v1302_v30 }
  0x7b   :  { %1051 = vmatpush3.bf16.msra.mxu0 %v1222_v16  ;;  %v1046_v16 = vld [vmem:[#allocation2] ss:$0 sm:$0xff] }
  0x7c   :  { %1052 = vmatprep.subr.bf16.mxu0 %v1223_v17 }
  0x7d   :  { %1088 = vmatpush3.bf16.msra.mxu1 %v1239_v34 }
  0x7e   :  { %1089 = vmatprep.subr.bf16.mxu1 %v1302_v30 }
  0x7f   :  { %1053 = vmatpush3.bf16.msra.mxu0 %v1224_v18 }
  0x80   :  { %1054 = vmatprep.subr.bf16.mxu0 %v1225_v19 }
  0x81   :  { %1090 = vmatpush3.bf16.msra.mxu1 %v1240_v35 }
  0x82   :  { %1091 = vmatprep.subr.bf16.mxu1 %v1302_v30 }
  0x83   :  { %1055 = vmatpush3.bf16.msra.mxu0 %v1226_v20 }
  0x84   :  { %1056 = vmatprep.subr.bf16.mxu0 %v1227_v21 }
  0x85   :  { %1092 = vmatpush3.bf16.msra.mxu1 %v1241_v59 }
  0x86   :  { %1093 = vmatprep.subr.bf16.mxu1 %v1302_v30 }
  0x87   :  { %1057 = vmatpush3.bf16.msra.mxu0 %v1228_v22 }
  0x88   :  { %1058 = vmatprep.subr.bf16.mxu0 %v1229_v23 }
  0x89   :  { %1094 = vmatpush3.bf16.msra.mxu1 %v1242_v60 }
  0x8b   :  { %1059 = vmatpush3.bf16.msra.mxu0 %v1230_v24 }
  0x8c   :  { %1060 = vmatprep.subr.bf16.mxu0 %v1231_v25 }
  0x8f   :  { %1061 = vmatpush3.bf16.msra.mxu0 %v1232_v26 }
  0x90   :  { %1062 = vmatprep.subr.bf16.mxu0 %v1233_v27 }
  0x93   :  { %1063 = vmatpush3.bf16.msra.mxu0 %v1234_v28 }
 0x13f   :  { %v530_v41 = vpop.f32.mrb[0].mxu1 }
 0x140   :  { %v532_v42 = vpop.f32.mrb[1].mxu1  ;;  %v531_v47 = vadd.f32 %v530_v41, %v136_v43 }
 0x141   :  { %v534_v44 = vpop.f32.mrb[2].mxu1  ;;  %v533_v48 = vadd.f32 %v532_v42, %v140_v45 }
 0x142   :  { %v535_v46 = vpop.f32.mrb[3].mxu1 }
 0x149   :  { %v612_v49 = vpop.f32.mrb[0].mxu0 }
 0x14a   :  { %v1100_v50 = vadd.f32 %v612_v49, %v531_v47  ;;  %v614_v51 = vpop.f32.mrb[1].mxu0 }
 0x14b   :  { %v1102_v52 = vadd.f32 %v614_v51, %v533_v48  ;;  %v616_v53 = vpop.f32.mrb[2].mxu0 }
 0x14c   :  { %v619_v54 = vmax.f32 %v1100_v50, 0.0  ;;  %v617_v55 = vpop.f32.mrb[3].mxu0 }
 0x14d   :  { %v620_v56 = vmax.f32 %v1102_v52, 0.0 }
 0x14e   :  { %v621_v58 = vpack.c.bf16 %v619_v54, %v619_v54 }
 0x14f   :  { %v622_v57 = vpack.c.bf16 %v620_v56, %v620_v56 }
 0x151   :  { %790 = vmatprep.mubr.bf16.mxu0 %v622_v57 }
 0x152   :  { %791 = vmatmul.mubr.bf16.vlgmr.msra.gmra.mrb[4].mxu0 %v621_v58 }
 0x225   :  { %v1064_v61 = vpop.f32.mrb[4].mxu0 }
 0x226   :  { %v1065_v63 = vpop.f32.mrb[5].mxu0 }
 0x227   :  { %v1066_v0 = vadd.f32 %v1065_v63, %v1064_v61  ;;  %v1067_v1 = vpop.f32.mrb[6].mxu0 }
 0x228   :  { %v1068_v2 = vpop.f32.mrb[7].mxu0 }
 0x229   :  { %v793_v3 = vadd.f32 %v1066_v0, %v1019_v62 }
 0x22b   :  { %v798_v4 = vmax.f32 %v793_v3, 0.0 }
 0x22d   :  { %v799_v5 = vpack.c.bf16 %v798_v4, %v798_v4 }
 0x22f   :  { %1096 = vmatmul.mubr.bf16.vlgmr.msra.gmra.mrb[4].mxu1 %v799_v5 }
 0x302   :  { %v905_v7 = vpop.f32.mrb[4].mxu1 }
 0x303   :  { %v906_v8 = vadd.f32 %v1036_v6, %v905_v7  ;;  %v1097_v9 = vpop.f32.mrb[5].mxu1 }
 0x304   :  { %v908_v10 = vpop.f32.mrb[6].mxu1 }
 0x305   :  { %v911_v12 = vmax.f32 %v906_v8, 0.0  ;;  %v1098_v13 = vpop.f32.mrb[7].mxu1 }
 0x307   :  { %v919_v14 = vmul.f32 %v1045_v11, %v911_v12 }
 0x309   :  { %v921_v15 = vsel %vm920_vm3, %v919_v14, 0.0 }
 0x30a   :  { %922 = vadd.xlane.f32.xlu0 %v921_v15 }
 0x397   :  { %v923_v17 = vpop.xlane.xlu0 %922 }
 0x398   :  { %v931_v18 = vadd.f32 %v1046_v16, %v923_v17 }
 0x39a   :  { %v1047_v19 = vmul.f32 -1.442695, %v931_v18 }
 0x39c   :  { %1243 = vpow2.f32 %v1047_v19 }
 0x3a6   :  { %v1244_v20 = vpop.eup %1243 }
 0x3a7   :  { %v935_v21 = vadd.f32 1.0, %v1244_v20 }
 0x3a9   :  { %1245 = vrcp.f32 %v935_v21 }
 0x3b3   :  { %v1246_v22 = vpop.eup %1245 }
 0x3b4   :  { %939 = vst.msk [vmem:[%s1440_s9] sm:$0xff] %vm938_vm4, %v1246_v22 }
 0x3b5   :  { %944 = vsyncpa [#allocation4], 1 }
 0x3b6   :  { %945 = vsyncpa [#allocation6], 1 }

</bundles_post_ra>
